<compile_context>
chip_gen: v6e
topology: v6e:2x2x1
jax: 0.10.0
libtpu: 0.0.40
codegen_flags: <defaults>
</compile_context>

<pallas_src>
import functools

import jax
import jax.numpy as jnp
import numpy as np
from jax.experimental import pallas as pl
from jax.experimental.pallas import tpu as pltpu


def _round_up(x, m):
    return ((x + m - 1) // m) * m


def _patch_embed_kernel(x_ref, w_ref, b_ref, o_ref):
    # x_ref: (tm, K)   w_ref: (K, tn)   b_ref: (1, tn) f32   o_ref: (tm, tn)
    acc = jnp.dot(x_ref[...], w_ref[...], preferred_element_type=jnp.float32)
    o_ref[...] = (acc + b_ref[...]).astype(o_ref.dtype)


def patch_embed_matmul(patches, weight, bias, *, tm=256, tn=None, out_dtype=None):
    """patches [M, K] @ weight [K, D] + bias [D] -> [M, D] on the MXU.

    f32 accumulation regardless of operand dtype.  Arbitrary M handled via
    zero padding; K and D padded to multiples of 128 (lane/sublane aligned,
    unmasked loads & stores); padding sliced off on return.
    """
    M, K = patches.shape
    Kw, D = weight.shape
    assert K == Kw
    out_dtype = out_dtype or patches.dtype

    # Aligned contraction dim: pad K to a multiple of 128 (zero rows/cols are
    # inert for the dot, and give unmasked vld on both operands).
    K_pad = _round_up(K, 128)
    if K_pad != K:
        patches = jnp.pad(patches, ((0, 0), (0, K_pad - K)))
        weight = jnp.pad(weight, ((0, K_pad - K), (0, 0)))

    # Lane-dense output: pad embed dim to a multiple of 128.
    D_pad = _round_up(D, 128)
    if D_pad != D:
        weight = jnp.pad(weight, ((0, 0), (0, D_pad - D)))
        bias = jnp.pad(bias, ((0, D_pad - D),))
    bias2d = bias.reshape(1, D_pad).astype(jnp.float32)  # bias add stays in f32

    # Tile D only if requested (needed only when K*D no longer fits VMEM);
    # by default the whole weight slab stays resident and is reused across M.
    tn = tn or D_pad
    assert tn % 128 == 0 and D_pad % tn == 0

    # Big MXU-friendly M tiles; tail tile handled by zero padding.
    sub = 8 if patches.dtype.itemsize == 4 else 16  # f32 vs bf16 sublane multiple
    tm_eff = max(sub, min(_round_up(tm, sub), _round_up(M, sub)))
    M_pad = _round_up(M, tm_eff)
    if M_pad != M:
        patches = jnp.pad(patches, ((0, M_pad - M), (0, 0)))

    nd, nm = D_pad // tn, M_pad // tm_eff

    px_b = patches.dtype.itemsize
    w_b = weight.dtype.itemsize
    o_b = np.dtype(out_dtype).itemsize

    # Double-buffered VMEM footprint estimate (+ headroom), capped for v7x's
    # 64 MiB physical VMEM.
    vmem_need = 2 * (tm_eff * K_pad * px_b + K_pad * tn * w_b + tn * 4
                     + tm_eff * tn * o_b)
    vmem_limit = int(min(max(2 * vmem_need, 32 << 20), 64 << 20))

    cost = pl.CostEstimate(
        flops=2 * M_pad * K_pad * D_pad,
        transcendentals=0,
        bytes_accessed=(M_pad * K_pad * px_b + K_pad * D_pad * w_b + D_pad * 4
                        + M_pad * D_pad * o_b),
    )

    out = pl.pallas_call(
        _patch_embed_kernel,
        out_shape=jax.ShapeDtypeStruct((M_pad, D_pad), out_dtype),
        # D outer (weight slab stays resident across the inner M sweep),
        # M inner (patches streamed).  Both axes fully parallel.
        grid=(nd, nm),
        in_specs=[
            pl.BlockSpec((tm_eff, K_pad), lambda j, i: (i, 0)),
            pl.BlockSpec((K_pad, tn), lambda j, i: (0, j)),
            pl.BlockSpec((1, tn), lambda j, i: (0, j)),
        ],
        out_specs=pl.BlockSpec((tm_eff, tn), lambda j, i: (i, j)),
        compiler_params=pltpu.CompilerParams(
            dimension_semantics=("parallel", "parallel"),
            vmem_limit_bytes=vmem_limit,
        ),
        cost_estimate=cost,
    )(patches, weight, bias2d)

    if M_pad != M or D_pad != D:
        out = out[:M, :D]
    return out


def patch_embed_v0_forward(x, conv_weight, conv_bias, patch_size, *,
                           compute_dtype=None, out_dtype=None, tm=256, tn=None):
    """x: [B, C, H, W] NCHW.  conv_weight: [D, C, ph, pw].  conv_bias: [D]."""
    B, C, H, W = x.shape
    ph, pw = patch_size
    D = conv_weight.shape[0]
    Hp, Wp = H // ph, W // pw
    num_patches = Hp * Wp

    # Patch extraction (glue): [B*num_patches, C*ph*pw] in (c, kh, kw) order,
    # matching the PyTorch Conv2d weight layout.
    patches = x.reshape(B, C, Hp, ph, Wp, pw)
    patches = jnp.transpose(patches, (0, 2, 4, 1, 3, 5))  # [B, Hp, Wp, C, ph, pw]
    patches = patches.reshape(B * num_patches, C * ph * pw)

    # Conv weight [D, C, ph, pw] -> matmul weight [C*ph*pw, D].
    w = conv_weight.reshape(D, C * ph * pw).T
    b = conv_bias

    if compute_dtype is not None:  # e.g. bf16 operands, f32 MXU accumulate
        patches = patches.astype(compute_dtype)
        w = w.astype(compute_dtype)

    out_dtype = out_dtype or x.dtype
    out = patch_embed_matmul(patches, w, b, tm=tm, tn=tn, out_dtype=out_dtype)
    out = out.reshape(B, num_patches, D)  # == conv(x).flatten(2).transpose(1, 2)
    # norm_layer=None -> Identity
    return out


if __name__ == "__main__":
    # Small, consistent shapes: B=2, C=4, img=16x16, patch=4x4, embed_dim=32
    B, C, H, W = 2, 4, 16, 16
    ph, pw = 4, 4
    embed_dim = 32

    key = jax.random.PRNGKey(0)
    kx, kw_, kb = jax.random.split(key, 3)
    x = jax.random.normal(kx, (B, C, H, W), dtype=jnp.float32)
    conv_weight = jax.random.normal(kw_, (embed_dim, C, ph, pw), dtype=jnp.float32) * 0.02
    conv_bias = jax.random.normal(kb, (embed_dim,), dtype=jnp.float32) * 0.02

    # Reference (plain JAX conv-as-matmul, f32).
    patches_ref = jnp.transpose(
        x.reshape(B, C, H // ph, ph, W // pw, pw), (0, 2, 4, 1, 3, 5)
    ).reshape(B, (H // ph) * (W // pw), C * ph * pw)
    ref = patches_ref @ conv_weight.reshape(embed_dim, -1).T + conv_bias

    # f32 path (exact semantics of the PyTorch module), jitted so the glue
    # reshape/transpose + padding fuses with the pallas_call.
    fwd_f32 = jax.jit(functools.partial(patch_embed_v0_forward, patch_size=(ph, pw)))
    out_f32 = jax.block_until_ready(fwd_f32(x, conv_weight, conv_bias))
    assert out_f32.shape == (B, (H // ph) * (W // pw), embed_dim)
    assert jnp.allclose(out_f32, ref, atol=1e-4, rtol=1e-4)

    # bf16 fast path (bf16 operands, f32 accumulation, bf16 output).
    fwd_bf16 = jax.jit(functools.partial(
        patch_embed_v0_forward, patch_size=(ph, pw),
        compute_dtype=jnp.bfloat16, out_dtype=jnp.bfloat16))
    out_bf16 = jax.block_until_ready(fwd_bf16(x, conv_weight, conv_bias))
    assert out_bf16.shape == (B, (H // ph) * (W // pw), embed_dim)
    assert jnp.allclose(out_bf16.astype(jnp.float32), ref, atol=3e-2, rtol=3e-2)

    print("KERNEL_OK")
</pallas_src>

<mosaic_0001>
module attributes {stable_mosaic.version = 11 : i64} {
  func.func @_patch_embed_kernel(%arg0: i32, %arg1: i32, %arg2: memref<32x128xf32, #tpu.memory_space<vmem>>, %arg3: memref<128x128xf32, #tpu.memory_space<vmem>>, %arg4: memref<1x128xf32, #tpu.memory_space<vmem>>, %arg5: memref<32x128xf32, #tpu.memory_space<vmem>>) attributes {dimension_semantics = [#tpu.dimension_semantics<parallel>, #tpu.dimension_semantics<parallel>], iteration_bounds = array<i64: 1, 1>, scalar_prefetch = 0 : i64, scratch_operands = 0 : i64, tpu.core_type = #tpu.core_type<tc>, window_params = [{transform_indices = @transform_0, window_bounds = array<i64: 32, 128>}, {transform_indices = @transform_1, window_bounds = array<i64: 128, 128>}, {transform_indices = @transform_2, window_bounds = array<i64: 1, 128>}, {transform_indices = @transform_3, window_bounds = array<i64: 32, 128>}]} {
    %c0 = arith.constant 0 : index
    %c0_0 = arith.constant 0 : index
    %0 = vector.load %arg2[%c0, %c0_0] : memref<32x128xf32, #tpu.memory_space<vmem>>, vector<32x128xf32>
    %c0_1 = arith.constant 0 : index
    %c0_2 = arith.constant 0 : index
    %1 = vector.load %arg3[%c0_1, %c0_2] : memref<128x128xf32, #tpu.memory_space<vmem>>, vector<128x128xf32>
    %cst = arith.constant dense<0.000000e+00> : vector<32x128xf32>
    %2 = tpu.matmul %0, %1, %cst {dimension_numbers = #tpu.dot_dimension_numbers<[1], [0], [0], [1], [0, 0, 1, 1], [], []>} : vector<32x128xf32>, vector<128x128xf32>, vector<32x128xf32> -> vector<32x128xf32>
    %c0_3 = arith.constant 0 : index
    %c0_4 = arith.constant 0 : index
    %3 = vector.load %arg4[%c0_3, %c0_4] : memref<1x128xf32, #tpu.memory_space<vmem>>, vector<1x128xf32>
    %4 = vector.broadcast %3 : vector<1x128xf32> to vector<32x128xf32>
    %5 = arith.addf %2, %4 : vector<32x128xf32>
    %c0_5 = arith.constant 0 : index
    %c0_6 = arith.constant 0 : index
    %6 = vector.load %arg5[%c0_5, %c0_6] : memref<32x128xf32, #tpu.memory_space<vmem>>, vector<32x128xf32>
    tpu.vector_store %arg5[%c0_5, %c0_6], %5 {strides = array<i32>} : memref<32x128xf32, #tpu.memory_space<vmem>>, vector<32x128xf32>,
    return
  }
  func.func @transform_0(%arg0: i32, %arg1: i32) -> (i32, i32) {
    %c0_i32 = arith.constant 0 : i32
    %c0_i32_0 = arith.constant 0 : i32
    return %arg1, %c0_i32 : i32, i32
  }
  func.func @transform_1(%arg0: i32, %arg1: i32) -> (i32, i32) {
    %c0_i32 = arith.constant 0 : i32
    %c0_i32_0 = arith.constant 0 : i32
    return %c0_i32, %arg0 : i32, i32
  }
  func.func @transform_2(%arg0: i32, %arg1: i32) -> (i32, i32) {
    %c0_i32 = arith.constant 0 : i32
    %c0_i32_0 = arith.constant 0 : i32
    return %c0_i32, %arg0 : i32, i32
  }
  func.func @transform_3(%arg0: i32, %arg1: i32) -> (i32, i32) {
    %c0_i32 = arith.constant 0 : i32
    return %arg1, %arg0 : i32, i32
  }
}

</mosaic_0001>

<bundles_post_ra>
// kernel: patch_embed_v0_forward.1
= control target key start
LH: loop header
LB: loop body
LE: loop exit
PB: predicated region body
PF: predicated region fallthrough
CT: control target
= control target key end

     0   :  { %s352_s0 = inlined_call_operand.vmem [shape: f32[32,128], index: 0, kind: input, shape index: {}]   ;;  %s353_s1 = inlined_call_operand.vmem [shape: f32[128,128], index: 1, kind: input, shape index: {}]   ;;  %s354_s2 = inlined_call_operand.vmem [shape: f32[1,128], index: 2, kind: input, shape index: {}]   ;;  %s355_s3 = inlined_call_operand.hbm [shape: f32[32,128], index: 3, kind: output, shape index: {}]  }
   0x1   :  { %v34_v0 = vld [vmem:[%s353_s1 + $0x78] sm:$0xff]  ;;  %v33_v1 = vld [vmem:[%s353_s1 + $0x70] sm:$0xff]  ;;  %v32_v2 = vld [vmem:[%s353_s1 + $0x68] sm:$0xff] }
   0x2   :  { %168 = vmatprep.subr.mxu0 %v34_v0  ;;  %206 = vmatprep.subr.mxu1 %v34_v0  ;;  %v31_v3 = vld [vmem:[%s353_s1 + $0x60] sm:$0xff]  ;;  %v30_v4 = vld [vmem:[%s353_s1 + $0x58] sm:$0xff] }
   0x3   :  { %169 = vmatpush3.msra.mxu0 %v34_v0  ;;  %222 = vmatpush3.msra.mxu1 %v34_v0 }
   0x4   :  { %170 = vmatprep.subr.mxu0 %v33_v1  ;;  %207 = vmatprep.subr.mxu1 %v33_v1 }
   0x5   :  { %171 = vmatpush3.msra.mxu0 %v33_v1  ;;  %223 = vmatpush3.msra.mxu1 %v33_v1 }
   0x6   :  { %172 = vmatprep.subr.mxu0 %v32_v2  ;;  %208 = vmatprep.subr.mxu1 %v32_v2 }
   0x7   :  { %173 = vmatpush3.msra.mxu0 %v32_v2  ;;  %224 = vmatpush3.msra.mxu1 %v32_v2 }
   0x8   :  { %8 = vsyncpa [#allocation3], 0  ;;  %174 = vmatprep.subr.mxu0 %v31_v3  ;;  %209 = vmatprep.subr.mxu1 %v31_v3  ;;  %v29_v5 = vld [vmem:[%s353_s1 + $0x50] sm:$0xff]  ;;  %v28_v6 = vld [vmem:[%s353_s1 + $0x48] sm:$0xff]  ;;  %s263_s26 = smov [#allocation2]  }
   0x9   :  { %175 = vmatpush3.msra.mxu0 %v31_v3  ;;  %225 = vmatpush3.msra.mxu1 %v31_v3  ;;  %v27_v7 = vld [vmem:[%s353_s1 + $0x40] sm:$0xff]  ;;  %v26_v8 = vld [vmem:[%s353_s1 + $0x38] sm:$0xff]  ;;  %v25_v9 = vld [vmem:[%s353_s1 + $0x30] sm:$0xff]  ;;  %s136_s27 = sshll.u32 %s263_s26, 4  ;;  %s137_s27 = int_to_ptr.vmem [resolvable:$true] %s136_s27 }
   0xa   :  { %176 = vmatprep.subr.mxu0 %v30_v4  ;;  %210 = vmatprep.subr.mxu1 %v30_v4  ;;  %v24_v10 = vld [vmem:[%s353_s1 + $0x28] sm:$0xff]  ;;  %v23_v11 = vld [vmem:[%s353_s1 + $0x20] sm:$0xff]  ;;  %v22_v12 = vld [vmem:[%s353_s1 + $0x18] sm:$0xff]  ;;  %p246_p1 = scmp.lt.s32.totalorder %s137_s27, %s137_s27 }
   0xb   :  { %177 = vmatpush3.msra.mxu0 %v30_v4  ;;  %226 = vmatpush3.msra.mxu1 %v30_v4  ;;  %v21_v13 = vld [vmem:[%s353_s1 + $0x10] sm:$0xff]  ;;  %v20_v14 = vld [vmem:[%s353_s1 + $0x8] sm:$0xff]  ;;  %v19_v15 = vld [vmem:[%s353_s1] sm:$0xff] }
   0xc   :  { %178 = vmatprep.subr.mxu0 %v29_v5  ;;  %211 = vmatprep.subr.mxu1 %v29_v5  ;;  %v15_v16 = vld [vmem:[%s352_s0] sm:$0xff]  ;;  %v17_v17 = vld [vmem:[%s352_s0 + $0x10] sm:$0xff]  ;;  %v16_v18 = vld [vmem:[%s352_s0 + $0x8] sm:$0xff] }
   0xd   :  { %179 = vmatpush3.msra.mxu0 %v29_v5  ;;  %227 = vmatpush3.msra.mxu1 %v29_v5  ;;  %v18_v19 = vld [vmem:[%s352_s0 + $0x18] sm:$0xff]  ;;  %v147_v20 = vld [vmem:[%s354_s2] ss:$0 sm:$0xff]  ;;  %s241_s0 = scalar_lea.vmem %s137_s27, 512 }
   0xe   :  { %180 = vmatprep.subr.mxu0 %v28_v6  ;;  %212 = vmatprep.subr.mxu1 %v28_v6  ;;  %p242_p0 = scmp.ne.s32.totalorder %s137_s27, %s241_s0  ;;  %p247_p2 = scmp.lt.s32.totalorder %s241_s0, %s241_s0 }
   0xf   :  { %181 = vmatpush3.msra.mxu0 %v28_v6  ;;  %228 = vmatpush3.msra.mxu1 %v28_v6 }
  0x10   :  { %182 = vmatprep.subr.mxu0 %v27_v7  ;;  %213 = vmatprep.subr.mxu1 %v27_v7  ;;  %p248_p3 = por %p247_p2, %p246_p1 }
  0x11   :  { %183 = vmatpush3.msra.mxu0 %v27_v7  ;;  %229 = vmatpush3.msra.mxu1 %v27_v7 }
  0x12   :  { %184 = vmatprep.subr.mxu0 %v26_v8  ;;  %214 = vmatprep.subr.mxu1 %v26_v8  ;;  %p249_p4 = pnand %p248_p3, %p242_p0 }
  0x13   :  { %185 = vmatpush3.msra.mxu0 %v26_v8  ;;  %230 = vmatpush3.msra.mxu1 %v26_v8 }
  0x14   :  { %186 = vmatprep.subr.mxu0 %v25_v9  ;;  %215 = vmatprep.subr.mxu1 %v25_v9 }
  0x15   :  { %187 = vmatpush3.msra.mxu0 %v25_v9  ;;  %231 = vmatpush3.msra.mxu1 %v25_v9 }
  0x16   :  { %188 = vmatprep.subr.mxu0 %v24_v10  ;;  %216 = vmatprep.subr.mxu1 %v24_v10 }
  0x17   :  { %189 = vmatpush3.msra.mxu0 %v24_v10  ;;  %232 = vmatpush3.msra.mxu1 %v24_v10 }
  0x18   :  { %190 = vmatprep.subr.mxu0 %v23_v11  ;;  %217 = vmatprep.subr.mxu1 %v23_v11 }
  0x19   :  { %191 = vmatpush3.msra.mxu0 %v23_v11  ;;  %233 = vmatpush3.msra.mxu1 %v23_v11 }
  0x1a   :  { %192 = vmatprep.subr.mxu0 %v22_v12  ;;  %218 = vmatprep.subr.mxu1 %v22_v12 }
  0x1b   :  { %193 = vmatpush3.msra.mxu0 %v22_v12  ;;  %234 = vmatpush3.msra.mxu1 %v22_v12 }
  0x1c   :  { %194 = vmatprep.subr.mxu0 %v21_v13  ;;  %219 = vmatprep.subr.mxu1 %v21_v13 }
  0x1d   :  { %195 = vmatpush3.msra.mxu0 %v21_v13  ;;  %235 = vmatpush3.msra.mxu1 %v21_v13 }
  0x1e   :  { %196 = vmatprep.subr.mxu0 %v20_v14  ;;  %220 = vmatprep.subr.mxu1 %v20_v14 }
  0x1f   :  { %197 = vmatpush3.msra.mxu0 %v20_v14  ;;  %236 = vmatpush3.msra.mxu1 %v20_v14 }
  0x20   :  { %198 = vmatprep.subr.mxu0 %v19_v15  ;;  %221 = vmatprep.subr.mxu1 %v19_v15 }
  0x21   :  { %199 = vmatpush3.msra.mxu0 %v19_v15  ;;  %237 = vmatpush3.msra.mxu1 %v19_v15 }
  0x22   :  { %200 = vmatprep.mubr.f32.mxu0 %v15_v16  ;;  %203 = vmatprep.mubr.f32.mxu1 %v17_v17 }
  0x23   :  { %201 = vmatmul.mubr.f32.vlgmr.msra.gmra.mxu0 %v16_v18  ;;  %204 = vmatmul.mubr.f32.vlgmr.msra.gmra.mxu1 %v18_v19 }
  0xe3   :  { %v202_v21 = vpop.f32.mrf.mxu0  ;;  %v205_v22 = vpop.f32.mrf.mxu1 }
  0xe4   :  { %v114_v23 = vadd.f32 %v202_v21, %v147_v20  ;;  %v124_v24 = vadd.f32 %v205_v22, %v147_v20 }
  0xe5   :  { %v108_v25 = vpop.f32.mrf.mxu0  ;;  %v118_v26 = vpop.f32.mrf.mxu1 }
  0xe6   :  { %128 = vst [vmem:[#allocation2 + $0x8] sm:$0xff] %v114_v23  ;;  %130 = vst [vmem:[#allocation2 + $0x18] sm:$0xff] %v124_v24  ;;  %v109_v27 = vadd.f32 %v147_v20, %v108_v25  ;;  %v119_v28 = vadd.f32 %v147_v20, %v118_v26 }
  0xe8   :  { %127 = vst [vmem:[#allocation2] sm:$0xff] %v109_v27  ;;  %129 = vst [vmem:[#allocation2 + $0x10] sm:$0xff] %v119_v28 }
  0xe9   :  { %252 = shalt.err (!%p249_p4)
}
  0xea   :  { %s264_s2 = smov 128   ;;  %s265_s28 = smov 8  }
  0xeb   :  { %142 = dma.vmem_to_hbm [thread:$0]  %s137_s27, 512, %s355_s3, [#allocation3], %s264_s2, %s264_s2, %s265_s28  }
  0xec   :  { %261 = dma.done.wait [#allocation3], 512  }
  0xed   :  { %262 = vsyncadd [#allocation3], 4294966784 }
  0xee   :  { %146 = vsyncpa [#allocation3], 1 }

</bundles_post_ra>
